<compile_context>
chip_gen: v6e
topology: v6e:2x2x1
jax: 0.10.0
libtpu: 0.0.40
codegen_flags: <defaults>
</compile_context>

<pallas_src>
import jax
import jax.numpy as jnp
from jax.experimental import pallas as pl
from jax.experimental.pallas import tpu as pltpu

N, IN, OUT = 7, 7, 6
# Padded shapes: sublane multiple of 8; K = IN + 1 (ones column carries the
# bias); output lane dim kept at a full 128 lanes for an unmasked store.
NP, KP, OUTP = 8, 8, 128


def linear_dup_kernel(x_ref, w_ref, o_ref):
    # x_ref: (8, 8), w_ref: (8, 128), o_ref: (8, 128)
    # Single MXU pass; bias and the y-duplication are already folded into w.
    o_ref[...] = jnp.dot(
        x_ref[...], w_ref[...], preferred_element_type=jnp.float32
    ).astype(o_ref.dtype)


def prepare_params(w, b):
    """One-time parameter prep (NOT in the per-call hot path).

    w: (6, 7), b: (6,)  ->  w_pad: (8, 128) f32 with
      rows 0..6 = w.T duplicated into lanes 0..5 and 6..11,
      row  7    = b   duplicated into lanes 0..5 and 6..11 (hit by the ones
                  column appended to x), all other entries exactly zero.
    """
    wt = w.T.astype(jnp.float32)                       # (7, 6)
    w_pad = jnp.zeros((KP, OUTP), jnp.float32)
    w_pad = w_pad.at[:IN, :OUT].set(wt)
    w_pad = w_pad.at[:IN, OUT:2 * OUT].set(wt)         # stack+flatten duplication
    w_pad = w_pad.at[IN, :OUT].set(b)
    w_pad = w_pad.at[IN, OUT:2 * OUT].set(b)           # folded bias row
    return w_pad


def model_forward(x, w_pad):
    """x: (7, 7) f32, w_pad: (8, 128) prepared params -> (7, 12) f32."""
    # Per-call padding only for the activation: zero (8, 8) tile, valid rows
    # get x in cols 0..6 and a 1.0 in col 7 (bias pickup). Padding must stay
    # exactly zero so the K-padding contributes nothing to the valid output.
    x_pad = (
        jnp.zeros((NP, KP), jnp.float32)
        .at[:N, :IN].set(x)
        .at[:N, IN].set(1.0)
    )

    y_pad = pl.pallas_call(
        linear_dup_kernel,
        out_shape=jax.ShapeDtypeStruct((NP, OUTP), jnp.float32),
        in_specs=[
            pl.BlockSpec(memory_space=pltpu.MemorySpace.VMEM),
            pl.BlockSpec(memory_space=pltpu.MemorySpace.VMEM),
        ],
        out_specs=pl.BlockSpec(memory_space=pltpu.MemorySpace.VMEM),
        cost_estimate=pl.CostEstimate(
            flops=2 * NP * KP * OUTP,                                   # ~16K
            bytes_accessed=4 * (NP * KP + KP * OUTP + NP * OUTP),       # ~8 KiB
            transcendentals=0,
        ),
    )(x_pad, w_pad)

    # Valid (7, 12) slice: Linear output already duplicated along lanes.
    return y_pad[:N, :2 * OUT]


def reference_forward(x, w, b):
    y = x @ w.T + b
    return jnp.concatenate([y, y], axis=-1)


if __name__ == "__main__":
    key = jax.random.PRNGKey(0)
    kx, kw, kb = jax.random.split(key, 3)

    x = jax.random.normal(kx, (N, IN), dtype=jnp.float32)
    # Deterministic "nn.Linear(7, 6)" parameters (synthetic, not a checkpoint).
    w = jax.random.normal(kw, (OUT, IN), dtype=jnp.float32) * 0.1
    b = jax.random.normal(kb, (OUT,), dtype=jnp.float32) * 0.1

    w_pad = prepare_params(w, b)          # one-time, outside the hot path

    out = jax.block_until_ready(model_forward(x, w_pad))
    ref = reference_forward(x, w, b)

    assert out.shape == (N, 2 * OUT), out.shape
    assert jnp.allclose(out, ref, atol=1e-5, rtol=1e-5), "mismatch vs reference"

    # TODO(synk): the PyTorch forward's `if bool(random.getrandbits(1)): x = x.T`
    # branch is non-deterministic (and `random` is not imported there); the
    # deterministic no-transpose path is implemented.
    print("KERNEL_OK")
</pallas_src>

<mosaic_0001>
module attributes {stable_mosaic.version = 11 : i64} {
  func.func @linear_dup_kernel(%arg0: memref<8x8xf32, #tpu.memory_space<vmem>>, %arg1: memref<8x128xf32, #tpu.memory_space<vmem>>, %arg2: memref<8x128xf32, #tpu.memory_space<vmem>>) attributes {dimension_semantics = [], scalar_prefetch = 0 : i64, scratch_operands = 0 : i64, tpu.core_type = #tpu.core_type<tc>} {
    %c0 = arith.constant 0 : index
    %c0_0 = arith.constant 0 : index
    %0 = vector.load %arg0[%c0, %c0_0] : memref<8x8xf32, #tpu.memory_space<vmem>>, vector<8x8xf32>
    %c0_1 = arith.constant 0 : index
    %c0_2 = arith.constant 0 : index
    %1 = vector.load %arg1[%c0_1, %c0_2] : memref<8x128xf32, #tpu.memory_space<vmem>>, vector<8x128xf32>
    %cst = arith.constant dense<0.000000e+00> : vector<8x128xf32>
    %2 = tpu.matmul %0, %1, %cst {dimension_numbers = #tpu.dot_dimension_numbers<[1], [0], [0], [1], [0, 0, 1, 1], [], []>} : vector<8x8xf32>, vector<8x128xf32>, vector<8x128xf32> -> vector<8x128xf32>
    %c0_3 = arith.constant 0 : index
    %c0_4 = arith.constant 0 : index
    %3 = vector.load %arg2[%c0_3, %c0_4] : memref<8x128xf32, #tpu.memory_space<vmem>>, vector<8x128xf32>
    tpu.vector_store %arg2[%c0_3, %c0_4], %2 {strides = array<i32>} : memref<8x128xf32, #tpu.memory_space<vmem>>, vector<8x128xf32>,
    return
  }
}

</mosaic_0001>

<bundles_post_ra>
// kernel: tpu_custom_call.1
= control target key start
LH: loop header
LB: loop body
LE: loop exit
PB: predicated region body
PF: predicated region fallthrough
CT: control target
= control target key end

     0   :  { %7 = vsyncpa [#allocation3], 0  ;;  %s237_s0 = inlined_call_operand.hbm [shape: f32[8,8], index: 0, kind: input, shape index: {}]   ;;  %s238_s1 = inlined_call_operand.hbm [shape: f32[8,128], index: 1, kind: input, shape index: {}]   ;;  %s239_s2 = inlined_call_operand.hbm [shape: f32[8,128], index: 2, kind: output, shape index: {}]  }
   0x1   :  { %8 = vsyncpa [#allocation6], 0 }
   0x2   :  { %9 = vsyncpa [#allocation4], 0  ;;  %s208_s9 = smov [#allocation2]   ;;  %s209_s11 = smov [#allocation5]  }
   0x3   :  { %s16_s10 = sshll.u32 %s208_s9, 4  ;;  %s26_s12 = sshll.u32 %s209_s11, 4  ;;  %s17_s10 = int_to_ptr.vmem [resolvable:$true] %s16_s10  ;;  %s27_s12 = int_to_ptr.vmem [resolvable:$true] %s26_s12 }
   0x4   :  { %s150_s13 = scalar_lea.vmem %s17_s10, 128  ;;  %p155_p1 = scmp.lt.s32.totalorder %s17_s10, %s17_s10 }
   0x5   :  { %p151_p0 = scmp.ne.s32.totalorder %s17_s10, %s150_s13  ;;  %p156_p2 = scmp.lt.s32.totalorder %s150_s13, %s150_s13 }
   0x7   :  { %p157_p3 = por %p156_p2, %p155_p1 }
   0x9   :  { %p158_p4 = pnand %p157_p3, %p151_p0 }
   0xb   :  { %161 = shalt.err (!%p158_p4)
}
   0xc   :  { %19 = dma.hbm_to_vmem [thread:$0]  %s237_s0, 128, %s17_s10, [#allocation3]  }
   0xd   :  { %s170_s16 = scalar_lea.vmem %s27_s12, 128  ;;  %p175_p6 = scmp.lt.s32.totalorder %s27_s12, %s27_s12 }
   0xe   :  { %p171_p5 = scmp.ne.s32.totalorder %s27_s12, %s170_s16  ;;  %p176_p7 = scmp.lt.s32.totalorder %s170_s16, %s170_s16 }
  0x10   :  { %p177_p8 = por %p176_p7, %p175_p6 }
  0x12   :  { %p178_p9 = pnand %p177_p8, %p171_p5 }
  0x14   :  { %181 = shalt.err (!%p178_p9)
}
  0x15   :  { %29 = dma.hbm_to_vmem [thread:$0]  %s238_s1, 128, %s27_s12, [#allocation6]  }
  0x16   :  { %202 = dma.done.wait [#allocation3], 128  }
  0x17   :  { %203 = vsyncadd [#allocation3], 4294967168 }
  0x18   :  { %204 = dma.done.wait [#allocation6], 128  }
  0x19   :  { %205 = vsyncadd [#allocation6], 4294967168  ;;  %v210_v0 = vmov 0.0   ;;  %vm211_vm0 = vmmov 0   ;;  %vm38_vm1 = vcmask 64512   ;;  %v37_v1 = vld [vmem:[#allocation5] sm:$0xff] }
  0x1a   :  { %132 = vmatprep.subr.mxu0 %v210_v0  ;;  %134 = vmatprep.mubr.msk.f32.mxu0 %vm211_vm0, %v210_v0  ;;  %v36_v2 = vld [vmem:[#allocation2] sm:$0xff]  ;;  %s212_s0 = smov [#allocation7]  }
  0x1b   :  { %133 = vmatpush3.msra.mxu0 %v37_v1  ;;  %s119_s19 = sshll.u32 %s212_s0, 4  ;;  %s120_s19 = int_to_ptr.vmem [resolvable:$true] %s119_s19 }
  0x1c   :  { %135 = vmatmul.mubr.msk.f32.vlgmr.msra.gmra.mxu0 %vm38_vm1, %v36_v2  ;;  %s182_s1 = scalar_lea.vmem %s120_s19, 128  ;;  %p187_p11 = scmp.lt.s32.totalorder %s120_s19, %s120_s19 }
  0x1d   :  { %p183_p10 = scmp.ne.s32.totalorder %s120_s19, %s182_s1  ;;  %p188_p12 = scmp.lt.s32.totalorder %s182_s1, %s182_s1 }
  0x1f   :  { %p189_p13 = por %p188_p12, %p187_p11 }
  0x21   :  { %p190_p0 = pnand %p189_p13, %p183_p10 }
  0xdc   :  { %v108_v3 = vpop.f32.mrf.mxu0 }
  0xdd   :  { %112 = vst [vmem:[#allocation7] sm:$0xff] %v108_v3 }
  0xde   :  { %v136_v4 = vpop.f32.mrf.mxu0 }
  0xdf   :  { %193 = shalt.err (!%p190_p0)
}
  0xe0   :  { %122 = dma.vmem_to_hbm [thread:$0]  %s120_s19, 128, %s239_s2, [#allocation4]  }
  0xe1   :  { %206 = dma.done.wait [#allocation4], 128  }
  0xe2   :  { %207 = vsyncadd [#allocation4], 4294967168 }
  0xe3   :  { %126 = vsyncpa [#allocation3], 1 }
  0xe4   :  { %127 = vsyncpa [#allocation6], 1 }
  0xe5   :  { %128 = vsyncpa [#allocation4], 1 }

</bundles_post_ra>
